<compile_context>
chip_gen: v5e
topology: v5e:2x2
jax: 0.10.0
libtpu: 0.0.40
codegen_flags: <defaults>
</compile_context>

<pallas_src>
import functools

import jax
import jax.numpy as jnp
from jax.experimental import pallas as pl
from jax.experimental.pallas import tpu as pltpu

_LANES = 128
_ACC_ROWS = 32          # accumulator sublanes: 4 f32 vregs -> 4 add chains;
                        # also a multiple of every packed-dtype min tile (8/16/32)
_BLOCK_ROWS = 4096      # 4096 x 128 f32 = 2 MiB per input per grid step


def _round_up(x, m):
    return ((x + m - 1) // m) * m


def _hinge_block(x_ref, out_ref, *, hinge, n_valid, last_blk, block_rows):
    """Add this grid step's block contribution of sum(hinge(x)) into out_ref."""
    k = pl.program_id(0)
    full = block_rows * _LANES

    # Fast path: fully-valid interior blocks -- no mask, pure VPU.
    @pl.when(k < last_blk)
    def _interior():
        h = hinge(x_ref[...].astype(jnp.float32))
        out_ref[...] += h.reshape(-1, _ACC_ROWS, _LANES).sum(axis=0)

    # Tail block: mask out slots past the end of the input.  This also covers
    # the Pallas OOB overhang when the whole input is smaller than one block.
    @pl.when(k == last_blk)
    def _tail():
        remaining = n_valid - last_blk * full        # static Python int
        h = hinge(x_ref[...].astype(jnp.float32))
        if remaining < full:
            row_ids = jax.lax.broadcasted_iota(jnp.int32, (block_rows, _LANES), 0)
            lane_ids = jax.lax.broadcasted_iota(jnp.int32, (block_rows, _LANES), 1)
            # Select AFTER the hinge -> NaN/Inf garbage in OOB slots is dropped.
            h = jnp.where(row_ids * _LANES + lane_ids < remaining, h, 0.0)
        out_ref[...] += h.reshape(-1, _ACC_ROWS, _LANES).sum(axis=0)

    # k > last_blk (over-coverage when pos/neg sizes differ): nothing to do.


def _sn_dis_loss_kernel(pos_ref, neg_ref, out_pos_ref, out_neg_ref, *,
                        block_rows, n_pos, n_neg, last_blk_pos, last_blk_neg):
    k = pl.program_id(0)

    @pl.when(k == 0)
    def _init():
        out_pos_ref[...] = jnp.zeros_like(out_pos_ref)
        out_neg_ref[...] = jnp.zeros_like(out_neg_ref)

    _hinge_block(pos_ref, out_pos_ref,
                 hinge=lambda v: jnp.maximum(1.0 - v, 0.0),
                 n_valid=n_pos, last_blk=last_blk_pos, block_rows=block_rows)
    _hinge_block(neg_ref, out_neg_ref,
                 hinge=lambda v: jnp.maximum(1.0 + v, 0.0),
                 n_valid=n_neg, last_blk=last_blk_neg, block_rows=block_rows)


def _split_lanes(x):
    """Flatten to (bulk_2d, n_bulk, tail_1d, n_total) with no O(n) pad copy.

    bulk_2d is a free reshape of the first n_bulk = n - (n % 128) elements to a
    lane-dense (rows, 128) view; the <128-element tail (if any) is returned
    separately and summed in the XLA epilogue.
    """
    flat = jnp.asarray(x).reshape(-1)
    n = flat.shape[0]
    rem = n % _LANES
    n_bulk = n - rem
    tail = flat[n_bulk:] if rem else None
    bulk = flat[:n_bulk].reshape(-1, _LANES) if n_bulk else None
    return bulk, n_bulk, tail, n


def sn_dis_loss(pos, neg, weight=1.0):
    pos2d, m_pos, pos_tail, n_pos = _split_lanes(pos)
    neg2d, m_neg, neg_tail, n_neg = _split_lanes(neg)
    if n_pos == 0 or n_neg == 0:
        raise ValueError("SNDisLoss: pos and neg must be non-empty.")

    def _tail_sum(tail, sign):
        if tail is None:
            return jnp.float32(0.0)
        return jnp.sum(jnp.maximum(1.0 + sign * tail.astype(jnp.float32), 0.0))

    sum_pos_tail = _tail_sum(pos_tail, -1.0)
    sum_neg_tail = _tail_sum(neg_tail, 1.0)

    if m_pos == 0 or m_neg == 0:
        # Tiny (<128-element) input: nothing lane-aligned to stream through the
        # kernel -- that side fits in a single vreg, compute it directly.
        sum_pos = (sum_pos_tail if m_pos == 0 else
                   jnp.sum(jnp.maximum(1.0 - pos2d.astype(jnp.float32), 0.0)) + sum_pos_tail)
        sum_neg = (sum_neg_tail if m_neg == 0 else
                   jnp.sum(jnp.maximum(1.0 + neg2d.astype(jnp.float32), 0.0)) + sum_neg_tail)
        return weight * (sum_pos / n_pos + sum_neg / n_neg)

    rows_pos = m_pos // _LANES
    rows_neg = m_neg // _LANES
    rows_max = max(rows_pos, rows_neg)
    # Multiple of 32 sublanes: valid for f32 (8), bf16 (16) and int8/fp8 (32)
    # tilings, and matches the (32, 128) accumulator fold.
    block_rows = min(_BLOCK_ROWS, _round_up(rows_max, _ACC_ROWS))
    num_blocks = pl.cdiv(rows_max, block_rows)
    last_blk_pos = pl.cdiv(rows_pos, block_rows) - 1
    last_blk_neg = pl.cdiv(rows_neg, block_rows) - 1

    kernel = functools.partial(
        _sn_dis_loss_kernel,
        block_rows=block_rows,
        n_pos=m_pos, n_neg=m_neg,
        last_blk_pos=last_blk_pos, last_blk_neg=last_blk_neg,
    )

    out_pos, out_neg = pl.pallas_call(
        kernel,
        out_shape=(
            jax.ShapeDtypeStruct((_ACC_ROWS, _LANES), jnp.float32),
            jax.ShapeDtypeStruct((_ACC_ROWS, _LANES), jnp.float32),
        ),
        grid_spec=pltpu.PrefetchScalarGridSpec(
            num_scalar_prefetch=0,
            grid=(num_blocks,),
            in_specs=[
                # Clamp so over-coverage steps (pos/neg size mismatch) re-read a
                # valid block; the kernel skips compute for those steps.
                pl.BlockSpec((block_rows, _LANES),
                             lambda k: (jnp.minimum(k, last_blk_pos), 0)),
                pl.BlockSpec((block_rows, _LANES),
                             lambda k: (jnp.minimum(k, last_blk_neg), 0)),
            ],
            out_specs=[
                # Constant block index across k -> output tile resident across
                # the whole reduction (accumulator pattern).
                pl.BlockSpec((_ACC_ROWS, _LANES), lambda k: (0, 0)),
                pl.BlockSpec((_ACC_ROWS, _LANES), lambda k: (0, 0)),
            ],
        ),
        compiler_params=pltpu.CompilerParams(
            dimension_semantics=("arbitrary",),
            vmem_limit_bytes=48 * 1024 * 1024,   # safe on v7x (64 MiB physical)
        ),
    )(pos2d, neg2d)

    # Tiny XLA epilogue: cross-lane reduce the (32, 128) partial-sum slabs,
    # add the remainders, normalise, apply weight (may be a traced scalar).
    sum_pos = jnp.sum(out_pos) + sum_pos_tail
    sum_neg = jnp.sum(out_neg) + sum_neg_tail
    return weight * (sum_pos / n_pos + sum_neg / n_neg)


def _reference(pos, neg, weight=1.0):
    pos = jnp.asarray(pos, jnp.float32)
    neg = jnp.asarray(neg, jnp.float32)
    return weight * (
        jnp.mean(jax.nn.relu(1.0 - pos)) + jnp.mean(jax.nn.relu(1.0 + neg))
    )


if __name__ == "__main__":
    key = jax.random.PRNGKey(0)
    k_pos, k_neg = jax.random.split(key)
    # Discriminator scores for real (pos) and fake (neg) batches.
    pos = jax.random.normal(k_pos, (2, 4, 16, 16), dtype=jnp.float32)
    neg = jax.random.normal(k_neg, (2, 4, 16, 16), dtype=jnp.float32)

    out = sn_dis_loss(pos, neg, weight=1.0)
    out = jax.block_until_ready(out)

    ref = _reference(pos, neg, weight=1.0)
    assert jnp.allclose(out, ref, rtol=1e-5, atol=1e-5), (out, ref)
    print("KERNEL_OK")
</pallas_src>

<mosaic_0001>
module attributes {stable_mosaic.version = 11 : i64} {
  func.func @_sn_dis_loss_kernel(%arg0: i32, %arg1: memref<32x128xf32, #tpu.memory_space<vmem>>, %arg2: memref<32x128xf32, #tpu.memory_space<vmem>>, %arg3: memref<32x128xf32, #tpu.memory_space<vmem>>, %arg4: memref<32x128xf32, #tpu.memory_space<vmem>>) attributes {dimension_semantics = [#tpu.dimension_semantics<arbitrary>], iteration_bounds = array<i64: 1>, scalar_prefetch = 0 : i64, scratch_operands = 0 : i64, tpu.core_type = #tpu.core_type<tc>, window_params = [{transform_indices = @transform_0, window_bounds = array<i64: 32, 128>}, {transform_indices = @transform_1, window_bounds = array<i64: 32, 128>}, {pipeline_mode = #tpu.pipeline_mode<synchronous>, transform_indices = @transform_2, window_bounds = array<i64: 32, 128>}, {pipeline_mode = #tpu.pipeline_mode<synchronous>, transform_indices = @transform_3, window_bounds = array<i64: 32, 128>}]} {
    %c0_i32 = arith.constant 0 : i32
    %0 = arith.cmpi eq, %arg0, %c0_i32 : i32
    %1 = arith.extui %0 : i1 to i32
    %c0_i32_0 = arith.constant 0 : i32
    %2 = arith.cmpi ne, %1, %c0_i32_0 : i32
    scf.if %2 {
      %cst = arith.constant 0.000000e+00 : f32
      %15 = vector.broadcast %cst : f32 to vector<32x128xf32>
      %c0 = arith.constant 0 : index
      %c0_9 = arith.constant 0 : index
      %16 = vector.load %arg3[%c0, %c0_9] : memref<32x128xf32, #tpu.memory_space<vmem>>, vector<32x128xf32>
      tpu.vector_store %arg3[%c0, %c0_9], %15 {strides = array<i32>} : memref<32x128xf32, #tpu.memory_space<vmem>>, vector<32x128xf32>,
      %cst_10 = arith.constant 0.000000e+00 : f32
      %17 = vector.broadcast %cst_10 : f32 to vector<32x128xf32>
      %c0_11 = arith.constant 0 : index
      %c0_12 = arith.constant 0 : index
      %18 = vector.load %arg4[%c0_11, %c0_12] : memref<32x128xf32, #tpu.memory_space<vmem>>, vector<32x128xf32>
      tpu.vector_store %arg4[%c0_11, %c0_12], %17 {strides = array<i32>} : memref<32x128xf32, #tpu.memory_space<vmem>>, vector<32x128xf32>,
    } else {
    }
    %c0_i32_1 = arith.constant 0 : i32
    %3 = arith.cmpi slt, %arg0, %c0_i32_1 : i32
    %4 = arith.extui %3 : i1 to i32
    %c0_i32_2 = arith.constant 0 : i32
    %5 = arith.cmpi ne, %4, %c0_i32_2 : i32
    scf.if %5 {
      %c0 = arith.constant 0 : index
      %c0_9 = arith.constant 0 : index
      %15 = vector.load %arg1[%c0, %c0_9] : memref<32x128xf32, #tpu.memory_space<vmem>>, vector<32x128xf32>
      %cst = arith.constant 1.000000e+00 : f32
      %16 = vector.broadcast %cst : f32 to vector<32x128xf32>
      %17 = arith.subf %16, %15 : vector<32x128xf32>
      %cst_10 = arith.constant 0.000000e+00 : f32
      %18 = vector.broadcast %cst_10 : f32 to vector<32x128xf32>
      %19 = arith.maximumf %17, %18 : vector<32x128xf32>
      %c0_11 = arith.constant 0 : index
      %c0_12 = arith.constant 0 : index
      %20 = vector.load %arg3[%c0_11, %c0_12] : memref<32x128xf32, #tpu.memory_space<vmem>>, vector<32x128xf32>
      %21 = vector.shape_cast %19 : vector<32x128xf32> to vector<1x32x128xf32>
      %cst_13 = arith.constant dense<0.000000e+00> : vector<32x128xf32>
      %22 = vector.multi_reduction <add>, %21, %cst_13 [0] : vector<1x32x128xf32> to vector<32x128xf32>
      %23 = arith.addf %20, %22 : vector<32x128xf32>
      %c0_14 = arith.constant 0 : index
      %c0_15 = arith.constant 0 : index
      %24 = vector.load %arg3[%c0_14, %c0_15] : memref<32x128xf32, #tpu.memory_space<vmem>>, vector<32x128xf32>
      tpu.vector_store %arg3[%c0_14, %c0_15], %23 {strides = array<i32>} : memref<32x128xf32, #tpu.memory_space<vmem>>, vector<32x128xf32>,
    } else {
    }
    %c0_i32_3 = arith.constant 0 : i32
    %6 = arith.cmpi eq, %arg0, %c0_i32_3 : i32
    %7 = arith.extui %6 : i1 to i32
    %c0_i32_4 = arith.constant 0 : i32
    %8 = arith.cmpi ne, %7, %c0_i32_4 : i32
    scf.if %8 {
      %c0 = arith.constant 0 : index
      %c0_9 = arith.constant 0 : index
      %15 = vector.load %arg1[%c0, %c0_9] : memref<32x128xf32, #tpu.memory_space<vmem>>, vector<32x128xf32>
      %cst = arith.constant 1.000000e+00 : f32
      %16 = vector.broadcast %cst : f32 to vector<32x128xf32>
      %17 = arith.subf %16, %15 : vector<32x128xf32>
      %cst_10 = arith.constant 0.000000e+00 : f32
      %18 = vector.broadcast %cst_10 : f32 to vector<32x128xf32>
      %19 = arith.maximumf %17, %18 : vector<32x128xf32>
      %20 = tpu.iota {dimensions = array<i32: 0>} : vector<32x128xi32>
      %21 = tpu.iota {dimensions = array<i32: 1>} : vector<32x128xi32>
      %c128_i32 = arith.constant 128 : i32
      %22 = vector.broadcast %c128_i32 : i32 to vector<32x128xi32>
      %23 = arith.muli %20, %22 : vector<32x128xi32>
      %24 = arith.addi %23, %21 : vector<32x128xi32>
      %c2048_i32 = arith.constant 2048 : i32
      %25 = vector.broadcast %c2048_i32 : i32 to vector<32x128xi32>
      %26 = arith.cmpi slt, %24, %25 : vector<32x128xi32>
      %cst_11 = arith.constant 0.000000e+00 : f32
      %27 = vector.broadcast %cst_11 : f32 to vector<32x128xf32>
      %28 = arith.select %26, %19, %27 : vector<32x128xi1>, vector<32x128xf32>
      %c0_12 = arith.constant 0 : index
      %c0_13 = arith.constant 0 : index
      %29 = vector.load %arg3[%c0_12, %c0_13] : memref<32x128xf32, #tpu.memory_space<vmem>>, vector<32x128xf32>
      %30 = vector.shape_cast %28 : vector<32x128xf32> to vector<1x32x128xf32>
      %cst_14 = arith.constant dense<0.000000e+00> : vector<32x128xf32>
      %31 = vector.multi_reduction <add>, %30, %cst_14 [0] : vector<1x32x128xf32> to vector<32x128xf32>
      %32 = arith.addf %29, %31 : vector<32x128xf32>
      %c0_15 = arith.constant 0 : index
      %c0_16 = arith.constant 0 : index
      %33 = vector.load %arg3[%c0_15, %c0_16] : memref<32x128xf32, #tpu.memory_space<vmem>>, vector<32x128xf32>
      tpu.vector_store %arg3[%c0_15, %c0_16], %32 {strides = array<i32>} : memref<32x128xf32, #tpu.memory_space<vmem>>, vector<32x128xf32>,
    } else {
    }
    %c0_i32_5 = arith.constant 0 : i32
    %9 = arith.cmpi slt, %arg0, %c0_i32_5 : i32
    %10 = arith.extui %9 : i1 to i32
    %c0_i32_6 = arith.constant 0 : i32
    %11 = arith.cmpi ne, %10, %c0_i32_6 : i32
    scf.if %11 {
      %c0 = arith.constant 0 : index
      %c0_9 = arith.constant 0 : index
      %15 = vector.load %arg2[%c0, %c0_9] : memref<32x128xf32, #tpu.memory_space<vmem>>, vector<32x128xf32>
      %cst = arith.constant 1.000000e+00 : f32
      %16 = vector.broadcast %cst : f32 to vector<32x128xf32>
      %17 = arith.addf %16, %15 : vector<32x128xf32>
      %cst_10 = arith.constant 0.000000e+00 : f32
      %18 = vector.broadcast %cst_10 : f32 to vector<32x128xf32>
      %19 = arith.maximumf %17, %18 : vector<32x128xf32>
      %c0_11 = arith.constant 0 : index
      %c0_12 = arith.constant 0 : index
      %20 = vector.load %arg4[%c0_11, %c0_12] : memref<32x128xf32, #tpu.memory_space<vmem>>, vector<32x128xf32>
      %21 = vector.shape_cast %19 : vector<32x128xf32> to vector<1x32x128xf32>
      %cst_13 = arith.constant dense<0.000000e+00> : vector<32x128xf32>
      %22 = vector.multi_reduction <add>, %21, %cst_13 [0] : vector<1x32x128xf32> to vector<32x128xf32>
      %23 = arith.addf %20, %22 : vector<32x128xf32>
      %c0_14 = arith.constant 0 : index
      %c0_15 = arith.constant 0 : index
      %24 = vector.load %arg4[%c0_14, %c0_15] : memref<32x128xf32, #tpu.memory_space<vmem>>, vector<32x128xf32>
      tpu.vector_store %arg4[%c0_14, %c0_15], %23 {strides = array<i32>} : memref<32x128xf32, #tpu.memory_space<vmem>>, vector<32x128xf32>,
    } else {
    }
    %c0_i32_7 = arith.constant 0 : i32
    %12 = arith.cmpi eq, %arg0, %c0_i32_7 : i32
    %13 = arith.extui %12 : i1 to i32
    %c0_i32_8 = arith.constant 0 : i32
    %14 = arith.cmpi ne, %13, %c0_i32_8 : i32
    scf.if %14 {
      %c0 = arith.constant 0 : index
      %c0_9 = arith.constant 0 : index
      %15 = vector.load %arg2[%c0, %c0_9] : memref<32x128xf32, #tpu.memory_space<vmem>>, vector<32x128xf32>
      %cst = arith.constant 1.000000e+00 : f32
      %16 = vector.broadcast %cst : f32 to vector<32x128xf32>
      %17 = arith.addf %16, %15 : vector<32x128xf32>
      %cst_10 = arith.constant 0.000000e+00 : f32
      %18 = vector.broadcast %cst_10 : f32 to vector<32x128xf32>
      %19 = arith.maximumf %17, %18 : vector<32x128xf32>
      %20 = tpu.iota {dimensions = array<i32: 0>} : vector<32x128xi32>
      %21 = tpu.iota {dimensions = array<i32: 1>} : vector<32x128xi32>
      %c128_i32 = arith.constant 128 : i32
      %22 = vector.broadcast %c128_i32 : i32 to vector<32x128xi32>
      %23 = arith.muli %20, %22 : vector<32x128xi32>
      %24 = arith.addi %23, %21 : vector<32x128xi32>
      %c2048_i32 = arith.constant 2048 : i32
      %25 = vector.broadcast %c2048_i32 : i32 to vector<32x128xi32>
      %26 = arith.cmpi slt, %24, %25 : vector<32x128xi32>
      %cst_11 = arith.constant 0.000000e+00 : f32
      %27 = vector.broadcast %cst_11 : f32 to vector<32x128xf32>
      %28 = arith.select %26, %19, %27 : vector<32x128xi1>, vector<32x128xf32>
      %c0_12 = arith.constant 0 : index
      %c0_13 = arith.constant 0 : index
      %29 = vector.load %arg4[%c0_12, %c0_13] : memref<32x128xf32, #tpu.memory_space<vmem>>, vector<32x128xf32>
      %30 = vector.shape_cast %28 : vector<32x128xf32> to vector<1x32x128xf32>
      %cst_14 = arith.constant dense<0.000000e+00> : vector<32x128xf32>
      %31 = vector.multi_reduction <add>, %30, %cst_14 [0] : vector<1x32x128xf32> to vector<32x128xf32>
      %32 = arith.addf %29, %31 : vector<32x128xf32>
      %c0_15 = arith.constant 0 : index
      %c0_16 = arith.constant 0 : index
      %33 = vector.load %arg4[%c0_15, %c0_16] : memref<32x128xf32, #tpu.memory_space<vmem>>, vector<32x128xf32>
      tpu.vector_store %arg4[%c0_15, %c0_16], %32 {strides = array<i32>} : memref<32x128xf32, #tpu.memory_space<vmem>>, vector<32x128xf32>,
    } else {
    }
    return
  }
  func.func @transform_0(%arg0: i32) -> (i32, i32) {
    %c0_i32 = arith.constant 0 : i32
    %0 = arith.minsi %arg0, %c0_i32 : i32
    %c0_i32_0 = arith.constant 0 : i32
    %c0_i32_1 = arith.constant 0 : i32
    return %0, %c0_i32_0 : i32, i32
  }
  func.func @transform_1(%arg0: i32) -> (i32, i32) {
    %c0_i32 = arith.constant 0 : i32
    %0 = arith.minsi %arg0, %c0_i32 : i32
    %c0_i32_0 = arith.constant 0 : i32
    %c0_i32_1 = arith.constant 0 : i32
    return %0, %c0_i32_0 : i32, i32
  }
  func.func @transform_2(%arg0: i32) -> (i32, i32) {
    %c0_i32 = arith.constant 0 : i32
    %c0_i32_0 = arith.constant 0 : i32
    %c0_i32_1 = arith.constant 0 : i32
    return %c0_i32, %c0_i32_0 : i32, i32
  }
  func.func @transform_3(%arg0: i32) -> (i32, i32) {
    %c0_i32 = arith.constant 0 : i32
    %c0_i32_0 = arith.constant 0 : i32
    %c0_i32_1 = arith.constant 0 : i32
    return %c0_i32, %c0_i32_0 : i32, i32
  }
}

</mosaic_0001>

<bundles_post_ra>
// kernel: tpu_custom_call.1
= control target key start
LH: loop header
LB: loop body
LE: loop exit
PB: predicated region body
PF: predicated region fallthrough
CT: control target
= control target key end

     0   :  { %9 = vsyncpa [#allocation3], 0  ;;  %s437_s0 = inlined_call_operand.hbm [shape: f32[16,128], index: 0, kind: input, shape index: {}]   ;;  %s438_s1 = inlined_call_operand.hbm [shape: f32[16,128], index: 1, kind: input, shape index: {}]   ;;  %s439_s2 = inlined_call_operand.hbm [shape: f32[32,128], index: 2, kind: output, shape index: {0}]   ;;  %s440_s3 = inlined_call_operand.hbm [shape: f32[32,128], index: 3, kind: output, shape index: {1}]  }
   0x1   :  { %10 = vsyncpa [#allocation6], 0 }
   0x2   :  { %11 = vsyncpa [#allocation4], 0 }
   0x3   :  { %12 = vsyncpa [#allocation9], 0 }
   0x4   :  { %16 = vsyncadd [#allocation3], 256  ;;  %s17_s14 = sshll.u32 %s437_s0, 4  ;;  %s379_s15 = smov [#allocation2]   ;;  %s18_s14 = int_to_ptr.hbm [resolvable:$true] %s17_s14 }
   0x5   :  { %s19_s16 = sshll.u32 %s379_s15, 4  ;;  %s380_s17 = smov 128   ;;  %s20_s16 = int_to_ptr.vmem [resolvable:$true] %s19_s16 }
   0x6   :  { %s381_s18 = smov 8  }
   0x7   :  { %25 = dma.hbm_to_vmem [thread:$0]  %s18_s14, 256, %s20_s16, [#allocation3], %s380_s17, %s380_s17, %s381_s18  }
   0x8   :  { %29 = vsyncadd [#allocation6], 256  ;;  %s30_s21 = sshll.u32 %s438_s1, 4  ;;  %s382_s22 = smov [#allocation5]   ;;  %s31_s21 = int_to_ptr.hbm [resolvable:$true] %s30_s21 }
   0x9   :  { %s32_s23 = sshll.u32 %s382_s22, 4  ;;  %s33_s23 = int_to_ptr.vmem [resolvable:$true] %s32_s23 }
   0xa   :  { %38 = dma.hbm_to_vmem [thread:$0]  %s31_s21, 256, %s33_s23, [#allocation6], %s380_s17, %s380_s17, %s381_s18  }
   0xb   :  { %371 = dma.done.wait [#allocation3], 512  }
   0xc   :  { %372 = vsyncadd [#allocation3], 4294966784 }
   0xd   :  { %373 = dma.done.wait [#allocation6], 512  }
   0xe   :  { %374 = vsyncadd [#allocation6], 4294966784  ;;  %v106_v0 = vlaneseq  ;;  %v94_v11 = vld [vmem:[#allocation2] sm:$0xff]  ;;  %v95_v12 = vld [vmem:[#allocation2 + $0x8] sm:$0xff]  ;;  %s383_s0 = smov [#allocation7]   ;;  %s236_s26 = sshll.u32 %s439_s2, 4  ;;  %s237_s26 = int_to_ptr.hbm [resolvable:$true] %s236_s26 }
   0xf   :  { %v96_v13 = vld [vmem:[#allocation2 + $0x10] sm:$0xff]  ;;  %v98_v14 = vsub.f32 1.0, %v94_v11  ;;  %v99_v15 = vsub.f32 1.0, %v95_v12  ;;  %v97_v17 = vld [vmem:[#allocation2 + $0x18] sm:$0xff]  ;;  %v179_v18 = vld [vmem:[#allocation5] sm:$0xff]  ;;  %s234_s1 = sshll.u32 %s383_s0, 4  ;;  %s235_s1 = int_to_ptr.vmem [resolvable:$true] %s234_s1 }
  0x10   :  { %v107_v1 = vshrl.u32 %v106_v0, 7  ;;  %v112_v2 = vand.u32 127, %v106_v0  ;;  %v100_v19 = vsub.f32 1.0, %v96_v13  ;;  %v101_v21 = vsub.f32 1.0, %v97_v17  ;;  %v180_v23 = vld [vmem:[#allocation5 + $0x8] sm:$0xff]  ;;  %v181_v33 = vld [vmem:[#allocation5 + $0x10] sm:$0xff] }
  0x11   :  { %v102_v24 = vmax.f32 %v98_v14, 0.0  ;;  %v103_v25 = vmax.f32 %v99_v15, 0.0  ;;  %v183_v26 = vadd.f32 1.0, %v179_v18  ;;  %v184_v32 = vadd.f32 1.0, %v180_v23  ;;  %v182_v34 = vld [vmem:[#allocation5 + $0x18] sm:$0xff]  ;;  %s384_s27 = smov [#allocation8]  }
  0x12   :  { %v113_v3 = vmul.u32 128, %v107_v1  ;;  %v108_v4 = vadd.s32 8, %v107_v1  ;;  %v109_v5 = vadd.s32 16, %v107_v1  ;;  %v110_v6 = vadd.s32 24, %v107_v1  ;;  %s247_s28 = sshll.u32 %s384_s27, 4  ;;  %s249_s2 = sshll.u32 %s440_s3, 4  ;;  %s248_s28 = int_to_ptr.vmem [resolvable:$true] %s247_s28  ;;  %s250_s2 = int_to_ptr.hbm [resolvable:$true] %s249_s2 }
  0x13   :  { %v104_v27 = vmax.f32 %v100_v19, 0.0  ;;  %v105_v28 = vmax.f32 %v101_v21, 0.0  ;;  %v187_v31 = vmax.f32 %v183_v26, 0.0  ;;  %v188_v38 = vmax.f32 %v184_v32, 0.0 }
  0x14   :  { %v117_v7 = vadd.s32 %v113_v3, %v112_v2  ;;  %v114_v8 = vmul.u32 128, %v108_v4  ;;  %v115_v9 = vmul.u32 128, %v109_v5  ;;  %v116_v10 = vmul.u32 128, %v110_v6 }
  0x15   :  { %v185_v39 = vadd.f32 1.0, %v181_v33  ;;  %v186_v40 = vadd.f32 1.0, %v182_v34 }
  0x16   :  { %vm121_vm0 = vcmp.lt.s32.totalorder %v117_v7, 2048  ;;  %v118_v16 = vadd.s32 %v114_v8, %v112_v2  ;;  %v119_v20 = vadd.s32 %v115_v9, %v112_v2  ;;  %v120_v22 = vadd.s32 %v116_v10, %v112_v2 }
  0x17   :  { %v125_v29 = vsel %vm121_vm0, %v102_v24, 0.0  ;;  %v210_v37 = vsel %vm121_vm0, %v187_v31, 0.0  ;;  %v189_v42 = vmax.f32 %v185_v39, 0.0  ;;  %v190_v43 = vmax.f32 %v186_v40, 0.0 }
  0x18   :  { %vm122_vm1 = vcmp.lt.s32.totalorder %v118_v16, 2048  ;;  %vm123_vm2 = vcmp.lt.s32.totalorder %v119_v20, 2048  ;;  %vm124_vm3 = vcmp.lt.s32.totalorder %v120_v22, 2048  ;;  %141 = vst [vmem:[#allocation7] sm:$0xff] %v125_v29 }
  0x19   :  { %v126_v30 = vsel %vm122_vm1, %v103_v25, 0.0  ;;  %v127_v35 = vsel %vm123_vm2, %v104_v27, 0.0  ;;  %v128_v36 = vsel %vm124_vm3, %v105_v28, 0.0  ;;  %v211_v41 = vsel %vm122_vm1, %v188_v38, 0.0  ;;  %226 = vst [vmem:[#allocation8] sm:$0xff] %v210_v37 }
  0x1a   :  { %142 = vst [vmem:[#allocation7 + $0x8] sm:$0xff] %v126_v30  ;;  %v212_v44 = vsel %vm123_vm2, %v189_v42, 0.0  ;;  %v213_v45 = vsel %vm124_vm3, %v190_v43, 0.0 }
  0x1b   :  { %143 = vst [vmem:[#allocation7 + $0x10] sm:$0xff] %v127_v35 }
  0x1c   :  { %144 = vst [vmem:[#allocation7 + $0x18] sm:$0xff] %v128_v36 }
  0x1d   :  { %242 = dma.vmem_to_hbm [thread:$0]  %s235_s1, 512, %s237_s26, [#allocation4], %s380_s17, %s380_s17, %s381_s18   ;;  %227 = vst [vmem:[#allocation8 + $0x8] sm:$0xff] %v211_v41 }
  0x1e   :  { %228 = vst [vmem:[#allocation8 + $0x10] sm:$0xff] %v212_v44 }
  0x1f   :  { %229 = vst [vmem:[#allocation8 + $0x18] sm:$0xff] %v213_v45 }
  0x20   :  { %255 = dma.vmem_to_hbm [thread:$0]  %s248_s28, 512, %s250_s2, [#allocation9], %s380_s17, %s380_s17, %s381_s18  }
  0x21   :  { %375 = dma.done.wait [#allocation4], 512  }
  0x22   :  { %376 = vsyncadd [#allocation4], 4294966784 }
  0x23   :  { %377 = dma.done.wait [#allocation9], 512  }
  0x24   :  { %378 = vsyncadd [#allocation9], 4294966784 }
  0x25   :  { %264 = vsyncpa [#allocation3], 1 }
  0x26   :  { %265 = vsyncpa [#allocation6], 1 }
  0x27   :  { %266 = vsyncpa [#allocation4], 1 }
  0x28   :  { %267 = vsyncpa [#allocation9], 1 }

</bundles_post_ra>
